<compile_context>
chip_gen: v7x
topology: tpu7x:2x2x1
jax: 0.10.0
libtpu: 0.0.40
codegen_flags: <defaults>
</compile_context>

<pallas_src>
import functools

import jax
import jax.numpy as jnp
import numpy as np
from jax.experimental import pallas as pl
from jax.experimental.pallas import tpu as pltpu

_EPS = 1e-8
_LANES = 128
_MAX_TILE_FRAMES = 512   # frames (rows) per grid step, upper cap
_MIN_TILE_FRAMES = 16    # bf16 sublane packing granularity


def _cdiv(a, b):
    return -(-a // b)


def _round_up(x, m):
    return ((x + m - 1) // m) * m


# --------------------------------------------------------------------------
# Kernel: one row-tile of frames -> lane-dense partial sums (ssd | sst | L1log)
# --------------------------------------------------------------------------
def _spectral_tile_kernel(tf_ref, pf_ref, basis_ref, out_ref, *, fpad):
    basis = basis_ref[...]                                   # (n_fft, 2*fpad) bf16

    # ---- target side first: its temporaries die before the predicted matmul.
    t_rot = jnp.dot(tf_ref[...], basis, preferred_element_type=jnp.float32)
    t_re = t_rot[:, :fpad]
    t_im = t_rot[:, fpad:]
    mag_t2 = t_re * t_re + t_im * t_im
    # sst straight from re^2 + im^2 (no sqrt -> square round trip).
    out_ref[0, :, fpad:2 * fpad] = jnp.sum(mag_t2, axis=0, keepdims=True)
    mag_t = jnp.sqrt(mag_t2)

    # ---- predicted side.
    p_rot = jnp.dot(pf_ref[...], basis, preferred_element_type=jnp.float32)
    p_re = p_rot[:, :fpad]
    p_im = p_rot[:, fpad:]
    mag_p = jnp.sqrt(p_re * p_re + p_im * p_im)

    d = mag_t - mag_p
    out_ref[0, :, 0:fpad] = jnp.sum(d * d, axis=0, keepdims=True)

    # Single natural log of the ratio (half the EUP log work of log(t)-log(p));
    # the 1/ln(10) factor is applied once in the wrapper.  Exact division keeps
    # padded rows/bins at log(eps/eps) = 0 exactly, so no masking is needed.
    ldiff = jnp.log((mag_t + _EPS) / (mag_p + _EPS))
    out_ref[0, :, 2 * fpad:3 * fpad] = jnp.sum(jnp.abs(ldiff), axis=0, keepdims=True)


# --------------------------------------------------------------------------
# Wrapper helpers
# --------------------------------------------------------------------------
def _frame_signals(x, n_fft, hop_length):
    """torch.stft framing (center=True, pad_mode='reflect'), emitted in bf16."""
    pad = n_fft // 2
    x = x.astype(jnp.bfloat16)                              # halve framed-copy HBM traffic
    xp = jnp.pad(x, ((0, 0), (pad, pad)), mode="reflect")
    n_frames = 1 + (xp.shape[-1] - n_fft) // hop_length
    idx = (jnp.arange(n_frames)[:, None] * hop_length
           + jnp.arange(n_fft)[None, :])                    # (n_frames, n_fft)
    frames = jnp.take(xp, idx, axis=-1)                     # (B, n_frames, n_fft)
    return frames.reshape(-1, n_fft), n_frames


def _dft_basis(n_fft, win_length, fpad):
    """Windowed real-DFT basis, cos | -sin concatenated, bf16, zero-padded lanes."""
    n_freq = n_fft // 2 + 1
    n = np.arange(n_fft)[:, None]
    k = np.arange(n_freq)[None, :]
    ang = 2.0 * np.pi * n * k / n_fft
    # Rectangular window of length win_length, zero-padded centered to n_fft
    # (torch.stft default when window=None), folded into the basis rows.
    win = np.zeros((n_fft,), np.float32)
    left = (n_fft - win_length) // 2
    win[left:left + win_length] = 1.0
    basis = np.zeros((n_fft, 2 * fpad), np.float32)
    basis[:, :n_freq] = np.cos(ang) * win[:, None]
    basis[:, fpad:fpad + n_freq] = -np.sin(ang) * win[:, None]
    return jnp.asarray(basis, dtype=jnp.bfloat16)


def _vmem_budget_bytes():
    try:
        cap = int(pltpu.get_tpu_info().vmem_capacity_bytes)
    except Exception:
        cap = 64 * 1024 * 1024        # conservative fallback: v7x per-TC VMEM
    # 25% headroom for compiler-internal scratch; 96 MiB ceiling on 128 MiB parts.
    return min((cap * 3) // 4, 96 * 1024 * 1024)


def _select_tiling(rows, n_fft, fpad, budget):
    """Pick (n_tiles, tile_rows) from a per-step VMEM footprint model."""
    # frames: 2 signals x 2 pipeline buffers x n_fft bf16 per row
    # ~8 live lane-dense f32 temporaries per row (incl. the 2*fpad matmul result)
    per_row = 2 * 2 * n_fft * 2 + 8 * fpad * 4
    basis_bytes = n_fft * (2 * fpad) * 2                    # bf16, single-buffered
    fit = max(_MIN_TILE_FRAMES, (budget - basis_bytes) // per_row)
    cap_rows = max(_MIN_TILE_FRAMES,
                   min(_MAX_TILE_FRAMES, (fit // _MIN_TILE_FRAMES) * _MIN_TILE_FRAMES))
    n_tiles = _cdiv(rows, cap_rows)
    if n_tiles < 2 and rows > _MIN_TILE_FRAMES:
        n_tiles = 2                   # keep both v7x TensorCores busy
    tile_rows = _round_up(_cdiv(rows, n_tiles), _MIN_TILE_FRAMES)
    return n_tiles, tile_rows


# --------------------------------------------------------------------------
# Public entry point
# --------------------------------------------------------------------------
@functools.partial(jax.jit, static_argnames=("n_fft", "win_length", "hop_length"))
def spectral_loss(target, predicted, *, n_fft, win_length, hop_length):
    assert target.shape == predicted.shape and target.ndim == 2
    batch = target.shape[0]
    n_freq = n_fft // 2 + 1
    fpad = _round_up(n_freq, _LANES)

    t_frames, n_frames = _frame_signals(target, n_fft, hop_length)
    p_frames, _ = _frame_signals(predicted, n_fft, hop_length)
    rows = t_frames.shape[0]

    budget = _vmem_budget_bytes()
    n_tiles, tile_rows = _select_tiling(rows, n_fft, fpad, budget)
    rows_pad = n_tiles * tile_rows
    if rows_pad != rows:
        # Zero frames -> zero magnitudes -> contribute exactly 0 to all three sums.
        t_frames = jnp.pad(t_frames, ((0, rows_pad - rows), (0, 0)))
        p_frames = jnp.pad(p_frames, ((0, rows_pad - rows), (0, 0)))

    basis = _dft_basis(n_fft, win_length, fpad)

    kernel = functools.partial(_spectral_tile_kernel, fpad=fpad)
    partials = pl.pallas_call(
        kernel,
        out_shape=jax.ShapeDtypeStruct((n_tiles, 1, 3 * fpad), jnp.float32),
        grid_spec=pltpu.PrefetchScalarGridSpec(
            num_scalar_prefetch=0,
            grid=(n_tiles,),
            in_specs=[
                pl.BlockSpec((tile_rows, n_fft), lambda i: (i, 0)),   # target frames (bf16)
                pl.BlockSpec((tile_rows, n_fft), lambda i: (i, 0)),   # predicted frames (bf16)
                pl.BlockSpec((n_fft, 2 * fpad), lambda i: (0, 0),     # cos|-sin basis (bf16)
                             pipeline_mode=pl.Buffered(1)),           # grid-invariant: 1 buffer
            ],
            out_specs=pl.BlockSpec((1, 1, 3 * fpad), lambda i: (i, 0, 0)),
        ),
        compiler_params=pltpu.CompilerParams(
            dimension_semantics=("parallel",),
            vmem_limit_bytes=budget,
        ),
    )(t_frames, p_frames, basis)

    parts = partials.reshape(n_tiles, 3, fpad)
    ssd = jnp.sum(parts[:, 0, :])
    sst = jnp.sum(parts[:, 1, :])
    lab = jnp.sum(parts[:, 2, :])

    numel = batch * n_freq * n_frames
    convergence = jnp.sqrt(ssd) / (jnp.sqrt(sst) + _EPS)
    magnitude = (lab / np.log(10.0)) / numel
    return convergence + magnitude


# --------------------------------------------------------------------------
# Pure-JAX reference (torch.stft defaults: centered, reflect pad, onesided)
# --------------------------------------------------------------------------
def spectral_loss_ref(target, predicted, *, n_fft, win_length, hop_length):
    win = np.zeros((n_fft,), np.float32)
    left = (n_fft - win_length) // 2
    win[left:left + win_length] = 1.0
    win = jnp.asarray(win)

    def stft_mag(x):
        pad = n_fft // 2
        xp = jnp.pad(x, ((0, 0), (pad, pad)), mode="reflect")
        n_frames = 1 + (xp.shape[-1] - n_fft) // hop_length
        idx = (jnp.arange(n_frames)[:, None] * hop_length
               + jnp.arange(n_fft)[None, :])
        frames = jnp.take(xp, idx, axis=-1) * win
        return jnp.abs(jnp.fft.rfft(frames, n=n_fft, axis=-1))

    mt = stft_mag(target)
    mp = stft_mag(predicted)
    conv = jnp.linalg.norm((mt - mp).ravel()) / (jnp.linalg.norm(mt.ravel()) + _EPS)
    mag = jnp.sum(jnp.abs(jnp.log10(mt + _EPS) - jnp.log10(mp + _EPS))) / mt.size
    return conv + mag


if __name__ == "__main__":
    key = jax.random.PRNGKey(0)
    k1, k2 = jax.random.split(key)

    B, L = 2, 2048
    n_fft, win_length, hop_length = 128, 96, 32

    target = jax.random.normal(k1, (B, L), dtype=jnp.float32)
    predicted = target + 0.25 * jax.random.normal(k2, (B, L), dtype=jnp.float32)

    loss = jax.block_until_ready(
        spectral_loss(target, predicted, n_fft=n_fft,
                      win_length=win_length, hop_length=hop_length))
    ref = jax.block_until_ready(
        spectral_loss_ref(target, predicted, n_fft=n_fft,
                          win_length=win_length, hop_length=hop_length))

    # bf16 MXU feed (f32 accumulation) -> slightly looser tolerance than all-f32.
    assert jnp.allclose(loss, ref, rtol=2e-2, atol=2e-3), (loss, ref)
    print("KERNEL_OK")
</pallas_src>

<mosaic_0001>
module attributes {stable_mosaic.version = 11 : i64} {
  func.func @_spectral_tile_kernel(%arg0: i32, %arg1: memref<80x128xbf16, #tpu.memory_space<vmem>>, %arg2: memref<80x128xbf16, #tpu.memory_space<vmem>>, %arg3: memref<128x256xbf16, #tpu.memory_space<vmem>>, %arg4: memref<1x1x384xf32, #tpu.memory_space<vmem>>) attributes {dimension_semantics = [#tpu.dimension_semantics<parallel>], iteration_bounds = array<i64: 2>, scalar_prefetch = 0 : i64, scratch_operands = 0 : i64, tpu.core_type = #tpu.core_type<tc>, window_params = [{transform_indices = @transform_0, window_bounds = array<i64: 80, 128>}, {transform_indices = @transform_1, window_bounds = array<i64: 80, 128>}, {pipeline_mode = #tpu.pipeline_mode<synchronous>, transform_indices = @transform_2, window_bounds = array<i64: 128, 256>}, {transform_indices = @transform_3, window_bounds = array<i64: 1, 1, 384>}]} {
    %c0 = arith.constant 0 : index
    %c0_0 = arith.constant 0 : index
    %0 = vector.load %arg3[%c0, %c0_0] : memref<128x256xbf16, #tpu.memory_space<vmem>>, vector<128x256xbf16>
    %c0_1 = arith.constant 0 : index
    %c0_2 = arith.constant 0 : index
    %1 = vector.load %arg1[%c0_1, %c0_2] : memref<80x128xbf16, #tpu.memory_space<vmem>>, vector<80x128xbf16>
    %cst = arith.constant dense<0.000000e+00> : vector<80x256xf32>
    %2 = tpu.matmul %1, %0, %cst {dimension_numbers = #tpu.dot_dimension_numbers<[1], [0], [0], [1], [0, 0, 1, 1], [], []>} : vector<80x128xbf16>, vector<128x256xbf16>, vector<80x256xf32> -> vector<80x256xf32>
    %3 = vector.extract_strided_slice %2 {offsets = [0, 0], sizes = [80, 128], strides = [1, 1]} : vector<80x256xf32> to vector<80x128xf32>
    %4 = vector.extract_strided_slice %2 {offsets = [0, 128], sizes = [80, 128], strides = [1, 1]} : vector<80x256xf32> to vector<80x128xf32>
    %5 = arith.mulf %3, %3 : vector<80x128xf32>
    %6 = arith.mulf %4, %4 : vector<80x128xf32>
    %7 = arith.addf %5, %6 : vector<80x128xf32>
    %cst_3 = arith.constant dense<0.000000e+00> : vector<128xf32>
    %8 = vector.multi_reduction <add>, %7, %cst_3 [0] : vector<80x128xf32> to vector<128xf32>
    %9 = vector.shape_cast %8 : vector<128xf32> to vector<1x128xf32>
    %c0_4 = arith.constant 0 : index
    %c0_5 = arith.constant 0 : index
    %c128 = arith.constant 128 : index
    %10 = vector.load %arg4[%c0_4, %c0_5, %c128] : memref<1x1x384xf32, #tpu.memory_space<vmem>>, vector<1x1x128xf32>
    %11 = vector.shape_cast %10 : vector<1x1x128xf32> to vector<1x128xf32>
    %12 = vector.shape_cast %9 : vector<1x128xf32> to vector<1x1x128xf32>
    tpu.vector_store %arg4[%c0_4, %c0_5, %c128], %12 {strides = array<i32>} : memref<1x1x384xf32, #tpu.memory_space<vmem>>, vector<1x1x128xf32>,
    %13 = math.sqrt %7 : vector<80x128xf32>
    %c0_6 = arith.constant 0 : index
    %c0_7 = arith.constant 0 : index
    %14 = vector.load %arg2[%c0_6, %c0_7] : memref<80x128xbf16, #tpu.memory_space<vmem>>, vector<80x128xbf16>
    %cst_8 = arith.constant dense<0.000000e+00> : vector<80x256xf32>
    %15 = tpu.matmul %14, %0, %cst_8 {dimension_numbers = #tpu.dot_dimension_numbers<[1], [0], [0], [1], [0, 0, 1, 1], [], []>} : vector<80x128xbf16>, vector<128x256xbf16>, vector<80x256xf32> -> vector<80x256xf32>
    %16 = vector.extract_strided_slice %15 {offsets = [0, 0], sizes = [80, 128], strides = [1, 1]} : vector<80x256xf32> to vector<80x128xf32>
    %17 = vector.extract_strided_slice %15 {offsets = [0, 128], sizes = [80, 128], strides = [1, 1]} : vector<80x256xf32> to vector<80x128xf32>
    %18 = arith.mulf %16, %16 : vector<80x128xf32>
    %19 = arith.mulf %17, %17 : vector<80x128xf32>
    %20 = arith.addf %18, %19 : vector<80x128xf32>
    %21 = math.sqrt %20 : vector<80x128xf32>
    %22 = arith.subf %13, %21 : vector<80x128xf32>
    %23 = arith.mulf %22, %22 : vector<80x128xf32>
    %cst_9 = arith.constant dense<0.000000e+00> : vector<128xf32>
    %24 = vector.multi_reduction <add>, %23, %cst_9 [0] : vector<80x128xf32> to vector<128xf32>
    %25 = vector.shape_cast %24 : vector<128xf32> to vector<1x128xf32>
    %c0_10 = arith.constant 0 : index
    %c0_11 = arith.constant 0 : index
    %c0_12 = arith.constant 0 : index
    %26 = vector.load %arg4[%c0_10, %c0_11, %c0_12] : memref<1x1x384xf32, #tpu.memory_space<vmem>>, vector<1x1x128xf32>
    %27 = vector.shape_cast %26 : vector<1x1x128xf32> to vector<1x128xf32>
    %28 = vector.shape_cast %25 : vector<1x128xf32> to vector<1x1x128xf32>
    tpu.vector_store %arg4[%c0_10, %c0_11, %c0_12], %28 {strides = array<i32>} : memref<1x1x384xf32, #tpu.memory_space<vmem>>, vector<1x1x128xf32>,
    %cst_13 = arith.constant 9.99999993E-9 : f32
    %29 = vector.broadcast %cst_13 : f32 to vector<80x128xf32>
    %30 = arith.addf %13, %29 : vector<80x128xf32>
    %cst_14 = arith.constant 9.99999993E-9 : f32
    %31 = vector.broadcast %cst_14 : f32 to vector<80x128xf32>
    %32 = arith.addf %21, %31 : vector<80x128xf32>
    %33 = arith.divf %30, %32 : vector<80x128xf32>
    %34 = math.log %33 : vector<80x128xf32>
    %35 = math.absf %34 : vector<80x128xf32>
    %cst_15 = arith.constant dense<0.000000e+00> : vector<128xf32>
    %36 = vector.multi_reduction <add>, %35, %cst_15 [0] : vector<80x128xf32> to vector<128xf32>
    %37 = vector.shape_cast %36 : vector<128xf32> to vector<1x128xf32>
    %c0_16 = arith.constant 0 : index
    %c0_17 = arith.constant 0 : index
    %c256 = arith.constant 256 : index
    %38 = vector.load %arg4[%c0_16, %c0_17, %c256] : memref<1x1x384xf32, #tpu.memory_space<vmem>>, vector<1x1x128xf32>
    %39 = vector.shape_cast %38 : vector<1x1x128xf32> to vector<1x128xf32>
    %40 = vector.shape_cast %37 : vector<1x128xf32> to vector<1x1x128xf32>
    tpu.vector_store %arg4[%c0_16, %c0_17, %c256], %40 {strides = array<i32>} : memref<1x1x384xf32, #tpu.memory_space<vmem>>, vector<1x1x128xf32>,
    return
  }
  func.func @transform_0(%arg0: i32) -> (i32, i32) {
    %c0_i32 = arith.constant 0 : i32
    %c0_i32_0 = arith.constant 0 : i32
    return %arg0, %c0_i32 : i32, i32
  }
  func.func @transform_1(%arg0: i32) -> (i32, i32) {
    %c0_i32 = arith.constant 0 : i32
    %c0_i32_0 = arith.constant 0 : i32
    return %arg0, %c0_i32 : i32, i32
  }
  func.func @transform_2(%arg0: i32) -> (i32, i32) {
    %c0_i32 = arith.constant 0 : i32
    %c0_i32_0 = arith.constant 0 : i32
    %c0_i32_1 = arith.constant 0 : i32
    return %c0_i32, %c0_i32_0 : i32, i32
  }
  func.func @transform_3(%arg0: i32) -> (i32, i32, i32) {
    %c0_i32 = arith.constant 0 : i32
    %c0_i32_0 = arith.constant 0 : i32
    %c0_i32_1 = arith.constant 0 : i32
    return %arg0, %c0_i32, %c0_i32_0 : i32, i32, i32
  }
}

</mosaic_0001>

<bundles_post_ra>
// kernel: spectral_loss.1
= control target key start
LH: loop header
LB: loop body
LE: loop exit
PB: predicated region body
PF: predicated region fallthrough
CT: control target
= control target key end

     0   :  { %s1131_s12 = smov 0   ;;  %s1544_s0 = inlined_call_operand.vmem [shape: bf16[160,128], index: 0, kind: input, shape index: {}]   ;;  %s1545_s1 = inlined_call_operand.vmem [shape: bf16[160,128], index: 1, kind: input, shape index: {}]   ;;  %s1546_s2 = inlined_call_operand.vmem [shape: bf16[128,256], index: 2, kind: input, shape index: {}]   ;;  %s1547_s3 = inlined_call_operand.vmem [shape: f32[2,1,384], index: 3, kind: output, shape index: {}]  }
   0x1 LB: > { %s1137_s13 = sadd.s32 4294967295, %s1108_s12   ;;  %p947_p0 = scmp.ge.s32.totalorder %s1108_s12, 1  ;;  %s1108_s12 = sphi %s1131_s12, %s13_s12  }
   0x2   : > { %p149_p1 = scmp.lt.s32.totalorder %s1108_s12, 3 }
   0x4   : > { %p150_p2 = pnand %p947_p0, %p149_p1 }
   0x5   : > { %v988_v0 = vld [vmem:[%s1546_s2 + $0x4] ss:$8 sps:$4 sm:$0xff] (!%p150_p2)   ;;  %s177_s16 = smul.u32 (!%p150_p2), 10, %s1137_s13  ;;  %v990_v1 = vld [vmem:[%s1546_s2] ss:$8 sps:$4 sm:$0xff] (!%p150_p2)   ;;  %v1110_v2 = vmov (!%p150_p2), 0  }
   0x6   : > { %153 = sbr.rel (%p150_p2) target bundleno = 383 (0x17f), region = 32  ;;  %362 = vmatprep.mubr.bf16.mxu0 (!%p150_p2), %v1110_v2  ;;  %605 = vmatprep.mubr.bf16.mxu1 (!%p150_p2), %v1110_v2  ;;  %v991_v3 = vld [vmem:[%s1546_s2 + $0x14] ss:$8 sps:$4 sm:$0xff] (!%p150_p2)   ;;  %v993_v4 = vld [vmem:[%s1546_s2 + $0x10] ss:$8 sps:$4 sm:$0xff] (!%p150_p2)   ;;  %p189_p4 = scmp.lt.s32.totalorder (!%p150_p2), %s1137_s13, 1 }
   0x7   : > { %330 = vmatprep.subr.bf16.mxu0 (!%p150_p2), %v988_v0  ;;  %573 = vmatprep.subr.bf16.mxu1 (!%p150_p2), %v988_v0  ;;  %p178_p3 = scmp.lt.s32.totalorder (!%p150_p2), %s177_s16, 19  ;;  %v994_v5 = vld [vmem:[%s1546_s2 + $0x24] ss:$8 sps:$4 sm:$0xff] (!%p150_p2)   ;;  %v996_v6 = vld [vmem:[%s1546_s2 + $0x20] ss:$8 sps:$4 sm:$0xff] (!%p150_p2)  }
   0x8   : > { %331 = vmatpush1.bf16.msra.mxu0 (!%p150_p2), %v990_v1  ;;  %574 = vmatpush1.bf16.msra.mxu1 (!%p150_p2), %v990_v1  ;;  %v997_v7 = vld [vmem:[%s1546_s2 + $0x34] ss:$8 sps:$4 sm:$0xff] (!%p150_p2)   ;;  %v999_v8 = vld [vmem:[%s1546_s2 + $0x30] ss:$8 sps:$4 sm:$0xff] (!%p150_p2)   ;;  %v1000_v9 = vld [vmem:[%s1546_s2 + $0x44] ss:$8 sps:$4 sm:$0xff] (!%p150_p2)  }
   0x9   : > { %332 = vmatprep.subr.bf16.mxu0 (!%p150_p2), %v991_v3  ;;  %575 = vmatprep.subr.bf16.mxu1 (!%p150_p2), %v991_v3  ;;  %v1002_v10 = vld [vmem:[%s1546_s2 + $0x40] ss:$8 sps:$4 sm:$0xff] (!%p150_p2)   ;;  %v1003_v11 = vld [vmem:[%s1546_s2 + $0x54] ss:$8 sps:$4 sm:$0xff] (!%p150_p2)   ;;  %v1005_v12 = vld [vmem:[%s1546_s2 + $0x50] ss:$8 sps:$4 sm:$0xff] (!%p150_p2)  }
   0xa   : > { %v1006_v13 = vld [vmem:[%s1546_s2 + $0x64] ss:$8 sps:$4 sm:$0xff] (!%p150_p2)   ;;  %v1008_v14 = vld [vmem:[%s1546_s2 + $0x60] ss:$8 sps:$4 sm:$0xff] (!%p150_p2)   ;;  %v1009_v15 = vld [vmem:[%s1546_s2 + $0x74] ss:$8 sps:$4 sm:$0xff] (!%p150_p2)  }
   0xb   : > { %v1011_v16 = vld [vmem:[%s1546_s2 + $0x70] ss:$8 sps:$4 sm:$0xff] (!%p150_p2)  }
   0xc   : > { %333 = vmatpush1.bf16.msra.mxu0 (!%p150_p2), %v993_v4  ;;  %576 = vmatpush1.bf16.msra.mxu1 (!%p150_p2), %v993_v4 }
   0xd   : > { %s1551_s16 = smov (!%p178_p3, %s177_s16), 19  ;;  %334 = vmatprep.subr.bf16.mxu0 %v994_v5  ;;  %577 = vmatprep.subr.bf16.mxu1 %v994_v5  ;;  %s1553_s13 = smov (!%p189_p4, %s1137_s13), 1 }
   0xe   : > { %s948_s25 = sshll.u32 %s1551_s16, 2  ;;  %s978_s29 = smul.u32 3, %s1553_s13 }
   0xf   : > { %s1168_s5 = scalar_lea.vmem %s1544_s0, %s948_s25  ;;  %s1173_s8 = scalar_lea.vmem %s1545_s1, %s948_s25 }
  0x10   : > { %335 = vmatpush1.bf16.msra.mxu0 %v996_v6  ;;  %578 = vmatpush1.bf16.msra.mxu1 %v996_v6  ;;  %v1012_v17 = vld [vmem:[%s1168_s5] sm:$0xff]   ;;  %v1014_v19 = vld [vmem:[%s1168_s5 + $0x8] sm:$0xff]   ;;  %v1016_v21 = vld [vmem:[%s1168_s5 + $0x10] sm:$0xff]  }
  0x11   : > { %336 = vmatprep.subr.bf16.mxu0 %v997_v7  ;;  %579 = vmatprep.subr.bf16.mxu1 %v997_v7  ;;  %v1013_v18 = vld [vmem:[%s1173_s8] sm:$0xff]   ;;  %v1015_v20 = vld [vmem:[%s1173_s8 + $0x8] sm:$0xff]   ;;  %v1017_v22 = vld [vmem:[%s1173_s8 + $0x10] sm:$0xff]  }
  0x12   : > { %v1018_v23 = vld [vmem:[%s1168_s5 + $0x18] sm:$0xff]   ;;  %v1020_v25 = vld [vmem:[%s1168_s5 + $0x20] sm:$0xff]   ;;  %s1516_s5 = scalar_lea.vmem %s1547_s3, %s978_s29 }
  0x13   : > { %v1019_v24 = vld [vmem:[%s1173_s8 + $0x18] sm:$0xff]   ;;  %v1021_v26 = vld [vmem:[%s1173_s8 + $0x20] sm:$0xff]  }
  0x14   : > { %337 = vmatpush1.bf16.msra.mxu0 %v999_v8  ;;  %580 = vmatpush1.bf16.msra.mxu1 %v999_v8 }
  0x15   : > { %338 = vmatprep.subr.bf16.mxu0 %v1000_v9  ;;  %581 = vmatprep.subr.bf16.mxu1 %v1000_v9 }
  0x18   : > { %339 = vmatpush1.bf16.msra.mxu0 %v1002_v10  ;;  %582 = vmatpush1.bf16.msra.mxu1 %v1002_v10 }
  0x19   : > { %340 = vmatprep.subr.bf16.mxu0 %v1003_v11  ;;  %583 = vmatprep.subr.bf16.mxu1 %v1003_v11 }
  0x1c   : > { %341 = vmatpush1.bf16.msra.mxu0 %v1005_v12  ;;  %584 = vmatpush1.bf16.msra.mxu1 %v1005_v12 }
  0x1d   : > { %342 = vmatprep.subr.bf16.mxu0 %v1006_v13  ;;  %585 = vmatprep.subr.bf16.mxu1 %v1006_v13 }
  0x20   : > { %343 = vmatpush1.bf16.msra.mxu0 %v1008_v14  ;;  %586 = vmatpush1.bf16.msra.mxu1 %v1008_v14 }
  0x21   : > { %344 = vmatprep.subr.bf16.mxu0 %v1009_v15  ;;  %587 = vmatprep.subr.bf16.mxu1 %v1009_v15 }
  0x24   : > { %345 = vmatpush1.bf16.msra.mxu0 %v1011_v16  ;;  %588 = vmatpush1.bf16.msra.mxu1 %v1011_v16 }
  0x27   : > { %363 = vmatmul.mubr.bf16.vlgmr.msra.gmra.mrb[0].mxu0 %v1012_v17  ;;  %606 = vmatmul.mubr.bf16.vlgmr.msra.gmra.mrb[0].mxu1 %v1013_v18 }
  0x28   : > { %372 = vmatprep.mubr.bf16.mxu0 %v1110_v2  ;;  %615 = vmatprep.mubr.bf16.mxu1 %v1110_v2 }
  0x2f   : > { %373 = vmatmul.mubr.bf16.gmra.mrb[4].mxu0 %v1014_v19  ;;  %616 = vmatmul.mubr.bf16.gmra.mrb[4].mxu1 %v1015_v20 }
  0x30   : > { %382 = vmatprep.mubr.bf16.mxu0 %v1110_v2  ;;  %625 = vmatprep.mubr.bf16.mxu1 %v1110_v2 }
  0x37   : > { %383 = vmatmul.mubr.bf16.gmra.mrb[8].mxu0 %v1016_v21  ;;  %626 = vmatmul.mubr.bf16.gmra.mrb[8].mxu1 %v1017_v22 }
  0x38   : > { %392 = vmatprep.mubr.bf16.mxu0 %v1110_v2  ;;  %635 = vmatprep.mubr.bf16.mxu1 %v1110_v2 }
  0x3f   : > { %393 = vmatmul.mubr.bf16.gmra.mrb[12].mxu0 %v1018_v23  ;;  %636 = vmatmul.mubr.bf16.gmra.mrb[12].mxu1 %v1019_v24 }
  0x40   : > { %402 = vmatprep.mubr.bf16.mxu0 %v1110_v2  ;;  %645 = vmatprep.mubr.bf16.mxu1 %v1110_v2 }
  0x47   : > { %403 = vmatmul.mubr.bf16.gmra.mrb[16].mxu0 %v1020_v25  ;;  %646 = vmatmul.mubr.bf16.gmra.mrb[16].mxu1 %v1021_v26 }
  0xfa   : > { %v364_v27 = vpop.f32.mrb[0].mxu0  ;;  %v607_v28 = vpop.f32.mrb[0].mxu1 }
  0xfb   : > { %v413_v29 = vmul.f32 %v364_v27, %v364_v27  ;;  %v656_v30 = vmul.f32 %v607_v28, %v607_v28  ;;  %v366_v31 = vpop.f32.mrb[1].mxu0  ;;  %v609_v32 = vpop.f32.mrb[1].mxu1 }
  0xfc   : > { %v423_v33 = vmul.f32 %v366_v31, %v366_v31  ;;  %v666_v34 = vmul.f32 %v609_v32, %v609_v32  ;;  %v368_v35 = vpop.f32.mrb[2].mxu0  ;;  %v611_v36 = vpop.f32.mrb[2].mxu1 }
  0xfd   : > { %v414_v37 = vmul.f32 %v368_v35, %v368_v35  ;;  %v657_v38 = vmul.f32 %v611_v36, %v611_v36  ;;  %v370_v39 = vpop.f32.mrb[3].mxu0  ;;  %v613_v40 = vpop.f32.mrb[3].mxu1 }
  0xfe   : > { %v1220_v41 = vadd.f32 %v423_v33, %v413_v29  ;;  %v1222_v42 = vadd.f32 %v666_v34, %v656_v30  ;;  %v424_v43 = vmul.f32 %v370_v39, %v370_v39  ;;  %v667_v44 = vmul.f32 %v613_v40, %v613_v40 }
 0x100   : > { %1022 = vrsqrt.f32 %v1220_v41  ;;  %v1226_v45 = vadd.f32 %v424_v43, %v414_v37  ;;  %v1228_v46 = vadd.f32 %v667_v44, %v657_v38  ;;  %vm465_vm0 = vcmp.eq.f32.partialorder %v1220_v41, inf }
 0x101   : > { %1024 = vrsqrt.f32 %v1222_v42  ;;  %v468_v0 = vand.u32 2147483648, %v1220_v41  ;;  %vm467_vm1 = vcmp.eq.f32.partialorder %v1220_v41, 0.0  ;;  %vm688_vm2 = vcmp.eq.f32.partialorder %v1222_v42, inf }
 0x102   : > { %v374_v47 = vpop.f32.mrb[4].mxu0  ;;  %v617_v48 = vpop.f32.mrb[4].mxu1  ;;  %v443_v51 = vadd.f32 %v1226_v45, %v1220_v41  ;;  %1026 = vrsqrt.f32 %v1226_v45  ;;  %vm690_vm3 = vcmp.eq.f32.partialorder %v1222_v42, 0.0  ;;  %v691_v6 = vand.u32 2147483648, %v1222_v42 }
 0x103   : > { %v376_v49 = vpop.f32.mrb[5].mxu0  ;;  %v619_v50 = vpop.f32.mrb[5].mxu1  ;;  %v415_v52 = vmul.f32 %v374_v47, %v374_v47  ;;  %v658_v53 = vmul.f32 %v617_v48, %v617_v48  ;;  %1028 = vrsqrt.f32 %v1228_v46  ;;  %vm472_vm4 = vcmp.eq.f32.partialorder %v1226_v45, inf }
 0x104   : > { %v378_v54 = vpop.f32.mrb[6].mxu0  ;;  %v621_v55 = vpop.f32.mrb[6].mxu1  ;;  %v425_v58 = vmul.f32 %v376_v49, %v376_v49  ;;  %v668_v59 = vmul.f32 %v619_v50, %v619_v50  ;;  %v475_v12 = vand.u32 2147483648, %v1226_v45  ;;  %vm474_vm5 = vcmp.eq.f32.partialorder %v1226_v45, 0.0 }
 0x105   : > { %v380_v56 = vpop.f32.mrb[7].mxu0  ;;  %v623_v57 = vpop.f32.mrb[7].mxu1  ;;  %v416_v60 = vmul.f32 %v378_v54, %v378_v54  ;;  %v659_v61 = vmul.f32 %v621_v55, %v621_v55  ;;  %vm695_vm6 = vcmp.eq.f32.partialorder %v1228_v46, inf  ;;  %vm697_vm7 = vcmp.eq.f32.partialorder %v1228_v46, 0.0 }
 0x106   : > { %v426_v62 = vmul.f32 %v380_v56, %v380_v56  ;;  %v669_v63 = vmul.f32 %v623_v57, %v623_v57  ;;  %v1236_v1 = vadd.f32 %v425_v58, %v415_v52  ;;  %v1238_v2 = vadd.f32 %v668_v59, %v658_v53 }
 0x107   : > { %v698_v20 = vand.u32 2147483648, %v1228_v46 }
 0x108   : > { %v1242_v3 = vadd.f32 %v426_v62, %v416_v60  ;;  %v1244_v4 = vadd.f32 %v669_v63, %v659_v61  ;;  %v444_v7 = vadd.f32 %v443_v51, %v1236_v1  ;;  %1030 = vrsqrt.f32 %v1236_v1 }
 0x109   : > { %1032 = vrsqrt.f32 %v1238_v2  ;;  %vm479_vm8 = vcmp.eq.f32.partialorder %v1236_v1, inf  ;;  %v482_v26 = vand.u32 2147483648, %v1236_v1  ;;  %vm481_vm9 = vcmp.eq.f32.partialorder %v1236_v1, 0.0 }
 0x10a   : > { %v1023_v5 = vpop.eup %1022  ;;  %v384_v8 = vpop.f32.mrb[8].mxu0  ;;  %v445_v16 = vadd.f32 %v444_v7, %v1242_v3  ;;  %1034 = vrsqrt.f32 %v1242_v3  ;;  %vm702_vm10 = vcmp.eq.f32.partialorder %v1238_v2, inf  ;;  %vm704_vm11 = vcmp.eq.f32.partialorder %v1238_v2, 0.0 }
 0x10b   : > { %v627_v9 = vpop.f32.mrb[8].mxu1  ;;  %v1025_v10 = vpop.eup %1024  ;;  %v464_v11 = vmul.f32 %v1023_v5, %v1220_v41  ;;  %1036 = vrsqrt.f32 %v1244_v4  ;;  %v705_v33 = vand.u32 2147483648, %v1238_v2  ;;  %vm486_vm12 = vcmp.eq.f32.partialorder %v1242_v3, inf }
 0x10c   : > { %v386_v13 = vpop.f32.mrb[9].mxu0  ;;  %v629_v14 = vpop.f32.mrb[9].mxu1  ;;  %v687_v15 = vmul.f32 %v1025_v10, %v1222_v42  ;;  %v417_v35 = vmul.f32 %v384_v8, %v384_v8  ;;  %v660_v36 = vmul.f32 %v627_v9, %v627_v9  ;;  %v489_v39 = vand.u32 2147483648, %v1242_v3 }
 0x10d   : > { %v388_v17 = vpop.f32.mrb[10].mxu0  ;;  %v1258_v18 = vpop.f32.mrb[10].mxu1  ;;  %v466_v19 = vsel %vm465_vm0, %v1220_v41, %v464_v11  ;;  %v427_v44 = vmul.f32 %v386_v13, %v386_v13  ;;  %v670_v47 = vmul.f32 %v629_v14, %v629_v14  ;;  %vm488_vm13 = vcmp.eq.f32.partialorder %v1242_v3, 0.0 }
 0x10e   : > { %v1266_v21 = vpop.f32.mrb[11].mxu0  ;;  %v1268_v22 = vpop.f32.mrb[11].mxu1  ;;  %v469_v24 = vsel %vm467_vm1, %v468_v0, %v466_v19  ;;  %v689_v25 = vsel %vm688_vm2, %v1222_v42, %v687_v15  ;;  %vm709_vm14 = vcmp.eq.f32.partialorder %v1244_v4, inf  ;;  %v712_v55 = vand.u32 2147483648, %v1244_v4 }
 0x10f   : > { %v1027_v23 = vpop.eup %1026  ;;  %v692_v28 = vsel %vm690_vm3, %v691_v6, %v689_v25  ;;  %v792_v42 = vadd.f32 1e-08, %v469_v24  ;;  %v1317_v56 = vadd.f32 %v427_v44, %v417_v35  ;;  %v1319_v57 = vadd.f32 %v670_v47, %v660_v36 }
 0x110   : > { %v1029_v27 = vpop.eup %1028  ;;  %v471_v29 = vmul.f32 %v1027_v23, %v1226_v45  ;;  %v756_v30 = vsub.f32 %v469_v24, %v692_v28  ;;  %v802_v31 = vadd.f32 1e-08, %v692_v28  ;;  %v418_v6 = vmul.f32 %v388_v17, %v388_v17 }
 0x111   : > { %v694_v32 = vmul.f32 %v1029_v27, %v1228_v46  ;;  %v446_v5 = vadd.f32 %v445_v16, %v1317_v56  ;;  %v661_v14 = vmul.f32 %v1258_v18, %v1258_v18  ;;  %v428_v15 = vmul.f32 %v1266_v21, %v1266_v21 }
 0x112   : > { %v473_v34 = vsel %vm472_vm4, %v1226_v45, %v471_v29  ;;  %1038 = vrcp.f32 %v802_v31  ;;  %v1298_v40 = vpop.f32.mrb[12].mxu0  ;;  %v1300_v41 = vpop.f32.mrb[12].mxu1  ;;  %v766_v60 = vmul.f32 %v756_v30, %v756_v30  ;;  %v671_v19 = vmul.f32 %v1268_v22, %v1268_v22 }
 0x113   : > { %v1292_v37 = vsel %vm474_vm5, %v475_v12, %v473_v34  ;;  %v696_v38 = vsel %vm695_vm6, %v1228_v46, %v694_v32  ;;  %v1304_v48 = vpop.f32.mrb[13].mxu0  ;;  %v1306_v45 = vpop.f32.mrb[13].mxu1  ;;  %vm711_vm15 = vcmp.eq.f32.partialorder %v1244_v4, 0.0  ;;  %v1373_v34 = vadd.f32 %v428_v15, %v418_v6 }
 0x114   : > { %v699_v43 = vsel %vm697_vm7, %v698_v20, %v696_v38  ;;  %v1031_v49 = vpop.eup %1030  ;;  %v1311_v52 = vpop.f32.mrb[14].mxu0  ;;  %v793_v32 = vadd.f32 1e-08, %v1292_v37  ;;  %v1375_v35 = vadd.f32 %v671_v19, %v661_v14  ;;  %vm493_vm0 = vcmp.eq.f32.partialorder %v1317_v56, inf }
 0x115   : > { %v757_v50 = vsub.f32 %v1292_v37, %v699_v43  ;;  %v803_v51 = vadd.f32 1e-08, %v699_v43  ;;  %v1313_v53 = vpop.f32.mrb[14].mxu1  ;;  %v1033_v46 = vpop.eup %1032  ;;  %v478_v54 = vmul.f32 %v1031_v49, %v1236_v1  ;;  %v447_v43 = vadd.f32 %v446_v5, %v1373_v34 }
 0x116   : > { %v1321_v58 = vpop.f32.mrb[15].mxu0  ;;  %v1323_v59 = vpop.f32.mrb[15].mxu1  ;;  %v701_v62 = vmul.f32 %v1033_v46, %v1238_v2  ;;  %v419_v44 = vmul.f32 %v1298_v40, %v1298_v40  ;;  %vm495_vm1 = vcmp.eq.f32.partialorder %v1317_v56, 0.0  ;;  %vm716_vm2 = vcmp.eq.f32.partialorder %v1319_v57, inf }
 0x117   : > { %v767_v61 = vmul.f32 %v757_v50, %v757_v50  ;;  %1040 = vrcp.f32 %v803_v51  ;;  %v1035_v63 = vpop.eup %1034  ;;  %v480_v0 = vsel %vm479_vm8, %v1236_v1, %v478_v54  ;;  %v662_v50 = vmul.f32 %v1300_v41, %v1300_v41 }
 0x118   : > { %1042 = vrsqrt.f32 %v1317_v56  ;;  %v1037_v7 = vpop.eup %1036  ;;  %v483_v9 = vsel %vm481_vm9, %v482_v26, %v480_v0  ;;  %v703_v10 = vsel %vm702_vm10, %v1238_v2, %v701_v62  ;;  %v485_v11 = vmul.f32 %v1035_v63, %v1242_v3 }
 0x119   : > { %v776_v8 = vadd.f32 %v767_v61, %v766_v60  ;;  %v706_v12 = vsel %vm704_vm11, %v705_v33, %v703_v10  ;;  %v708_v13 = vmul.f32 %v1037_v7, %v1244_v4  ;;  %1044 = vrsqrt.f32 %v1319_v57 }
 0x11a   : > { %v758_v16 = vsub.f32 %v483_v9, %v706_v12  ;;  %v804_v1 = vadd.f32 1e-08, %v706_v12  ;;  %v487_v17 = vsel %vm486_vm12, %v1242_v3, %v485_v11  ;;  %v1349_v20 = vpop.f32.mrb[16].mxu0  ;;  %v1351_v2 = vpop.f32.mrb[16].mxu1  ;;  %v794_v36 = vadd.f32 1e-08, %v483_v9 }
 0x11b   : > { %v490_v23 = vsel %vm488_vm13, %v489_v39, %v487_v17  ;;  %v710_v18 = vsel %vm709_vm14, %v1244_v4, %v708_v13  ;;  %v1360_v21 = vpop.f32.mrb[17].mxu0  ;;  %v1362_v24 = vpop.f32.mrb[17].mxu1  ;;  %v429_v40 = vmul.f32 %v1304_v48, %v1304_v48  ;;  %v672_v54 = vmul.f32 %v1306_v45, %v1306_v45 }
 0x11c   : > { %v1039_v22 = vpop.eup %1038  ;;  %v768_v25 = vmul.f32 %v758_v16, %v758_v16  ;;  %1046 = vrcp.f32 %v804_v1  ;;  %v713_v26 = vsel %vm711_vm15, %v712_v55, %v710_v18  ;;  %v1364_v27 = vpop.f32.mrb[18].mxu0  ;;  %v795_v46 = vadd.f32 1e-08, %v490_v23 }
 0x11d   : > { %v1366_v3 = vpop.f32.mrb[18].mxu1  ;;  %v813_v28 = vmul.f32 %v1039_v22, %v792_v42  ;;  %v759_v29 = vsub.f32 %v490_v23, %v713_v26  ;;  %v805_v30 = vadd.f32 1e-08, %v713_v26  ;;  %v1368_v31 = vpop.f32.mrb[19].mxu0  ;;  %v496_v42 = vand.u32 2147483648, %v1317_v56 }
 0x11e   : > { %v1370_v4 = vpop.f32.mrb[19].mxu1  ;;  %v777_v33 = vadd.f32 %v776_v8, %v768_v25  ;;  %vm718_vm3 = vcmp.eq.f32.partialorder %v1319_v57, 0.0  ;;  %v420_v55 = vmul.f32 %v1311_v52, %v1311_v52  ;;  %v430_v60 = vmul.f32 %v1321_v58, %v1321_v58 }
 0x11f   : > { %1048 = vlog2.f32 %v813_v28  ;;  %v769_v38 = vmul.f32 %v759_v29, %v759_v29  ;;  %v719_v62 = vand.u32 2147483648, %v1319_v57  ;;  %vm500_vm4 = vcmp.eq.f32.partialorder %v1373_v34, inf }
 0x120   : > { %1050 = vrcp.f32 %v805_v30  ;;  %v1403_v48 = vadd.f32 %v429_v40, %v419_v44  ;;  %v1405_v45 = vadd.f32 %v672_v54, %v662_v50  ;;  %v503_v5 = vand.u32 2147483648, %v1373_v34 }
 0x121   : > { %v1041_v39 = vpop.eup %1040  ;;  %v778_v49 = vadd.f32 %v777_v33, %v769_v38  ;;  %1052 = vrsqrt.f32 %v1373_v34  ;;  %vm502_vm5 = vcmp.eq.f32.partialorder %v1373_v34, 0.0  ;;  %v1410_v52 = vadd.f32 %v430_v60, %v420_v55 }
 0x122   : > { %v1043_v37 = vpop.eup %1042  ;;  %v815_v47 = vmul.f32 %v1041_v39, %v793_v32  ;;  %1054 = vrsqrt.f32 %v1375_v35  ;;  %v448_v7 = vadd.f32 %v447_v43, %v1403_v48  ;;  %vm723_vm6 = vcmp.eq.f32.partialorder %v1375_v35, inf }
 0x123   : > { %v492_v51 = vmul.f32 %v1043_v37, %v1317_v56  ;;  %v1045_v61 = vpop.eup %1044  ;;  %vm725_vm7 = vcmp.eq.f32.partialorder %v1375_v35, 0.0  ;;  %v726_v10 = vand.u32 2147483648, %v1375_v35  ;;  %v663_v11 = vmul.f32 %v1313_v53, %v1313_v53 }
 0x124   : > { %1056 = vlog2.f32 %v815_v47  ;;  %v715_v0 = vmul.f32 %v1045_v61, %v1319_v57  ;;  %v673_v16 = vmul.f32 %v1323_v59, %v1323_v59  ;;  %v449_v19 = vadd.f32 %v448_v7, %v1410_v52 }
 0x125   : > { %v494_v41 = vsel %vm493_vm0, %v1317_v56, %v492_v51  ;;  %1058 = vrsqrt.f32 %v1403_v48  ;;  %vm507_vm8 = vcmp.eq.f32.partialorder %v1403_v48, inf  ;;  %v510_v59 = vand.u32 2147483648, %v1403_v48 }
 0x126   : > { %v1047_v63 = vpop.eup %1046  ;;  %v497_v58 = vsel %vm495_vm1, %v496_v42, %v494_v41  ;;  %v717_v8 = vsel %vm716_vm2, %v1319_v57, %v715_v0  ;;  %1060 = vrsqrt.f32 %v1405_v45  ;;  %v421_v57 = vmul.f32 %v1349_v20, %v1349_v20 }
 0x127   : > { %v817_v6 = vmul.f32 %v1047_v63, %v794_v36  ;;  %v720_v56 = vsel %vm718_vm3, %v719_v62, %v717_v8  ;;  %v796_v14 = vadd.f32 1e-08, %v497_v58  ;;  %v1440_v30 = vadd.f32 %v673_v16, %v663_v11 }
 0x128   : > { %v760_v13 = vsub.f32 %v497_v58, %v720_v56  ;;  %v806_v15 = vadd.f32 1e-08, %v720_v56  ;;  %vm509_vm9 = vcmp.eq.f32.partialorder %v1403_v48, 0.0  ;;  %v431_v36 = vmul.f32 %v1360_v21, %v1360_v21 }
 0x129   : > { %v1049_v9 = vpop.eup %1048  ;;  %1062 = vlog2.f32 %v817_v6  ;;  %vm730_vm10 = vcmp.eq.f32.partialorder %v1405_v45, inf  ;;  %vm732_vm11 = vcmp.eq.f32.partialorder %v1405_v45, 0.0  ;;  %v733_v21 = vand.u32 2147483648, %v1405_v45 }
 0x12a   : > { %v1051_v12 = vpop.eup %1050  ;;  %1064 = vrsqrt.f32 %v1410_v52  ;;  %v833_v18 = vmul.f32 0.6931472, %v1049_v9  ;;  %v770_v22 = vmul.f32 %v760_v13, %v760_v13  ;;  %v1457_v50 = vadd.f32 %v431_v36, %v421_v57 }
 0x12b   : > { %v1053_v1 = vpop.eup %1052  ;;  %v819_v17 = vmul.f32 %v1051_v12, %v795_v46  ;;  %1066 = vrcp.f32 %v806_v15  ;;  %v664_v40 = vmul.f32 %v1351_v2, %v1351_v2  ;;  %v674_v2 = vmul.f32 %v1362_v24, %v1362_v24 }
 0x12c   : > { %v1055_v23 = vpop.eup %1054  ;;  %v499_v53 = vmul.f32 %v1053_v1, %v1373_v34  ;;  %v779_v29 = vadd.f32 %v778_v49, %v770_v22  ;;  %v852_v38 = vand.u32 2147483647, %v833_v18  ;;  %v450_v55 = vadd.f32 %v449_v19, %v1457_v50 }
 0x12d   : > { %1068 = vlog2.f32 %v819_v17  ;;  %v722_v26 = vmul.f32 %v1055_v23, %v1375_v35  ;;  %vm514_vm12 = vcmp.eq.f32.partialorder %v1410_v52, inf  ;;  %v517_v11 = vand.u32 2147483648, %v1410_v52 }
 0x12e   : > { %v1057_v25 = vpop.eup %1056  ;;  %v501_v20 = vsel %vm500_vm4, %v1373_v34, %v499_v53  ;;  %1070 = vrsqrt.f32 %v1440_v30  ;;  %vm516_vm13 = vcmp.eq.f32.partialorder %v1410_v52, 0.0  ;;  %vm737_vm14 = vcmp.eq.f32.partialorder %v1440_v30, inf }
 0x12f   : > { %v835_v28 = vmul.f32 0.6931472, %v1057_v25  ;;  %v504_v32 = vsel %vm502_vm5, %v503_v5, %v501_v20  ;;  %v724_v33 = vsel %vm723_vm6, %v1375_v35, %v722_v26  ;;  %v1059_v43 = vpop.eup %1058  ;;  %v422_v17 = vmul.f32 %v1364_v27, %v1364_v27 }
 0x130   : > { %v727_v42 = vsel %vm725_vm7, %v726_v10, %v724_v33  ;;  %v1061_v37 = vpop.eup %1060  ;;  %v506_v49 = vmul.f32 %v1059_v43, %v1403_v48  ;;  %v797_v16 = vadd.f32 1e-08, %v504_v32  ;;  %v740_v23 = vand.u32 2147483648, %v1440_v30 }
 0x131   : > { %v853_v39 = vand.u32 2147483647, %v835_v28  ;;  %v761_v44 = vsub.f32 %v504_v32, %v727_v42  ;;  %v807_v34 = vadd.f32 1e-08, %v727_v42  ;;  %v729_v46 = vmul.f32 %v1061_v37, %v1405_v45 }
 0x132   : > { %v508_v41 = vsel %vm507_vm8, %v1403_v48, %v506_v49  ;;  %vm739_vm15 = vcmp.eq.f32.partialorder %v1440_v30, 0.0  ;;  %v432_v53 = vmul.f32 %v1368_v31, %v1368_v31  ;;  %v675_v25 = vmul.f32 %v1370_v4, %v1370_v4 }
 0x133   : > { %v862_v47 = vadd.f32 %v853_v39, %v852_v38  ;;  %v1063_v51 = vpop.eup %1062  ;;  %v771_v35 = vmul.f32 %v761_v44, %v761_v44  ;;  %1072 = vrcp.f32 %v807_v34  ;;  %v511_v62 = vsel %vm509_vm9, %v510_v59, %v508_v41 }
 0x134   : > { %v837_v54 = vmul.f32 0.6931472, %v1063_v51  ;;  %1074 = vrsqrt.f32 %v1457_v50  ;;  %v1065_v60 = vpop.eup %1064  ;;  %v731_v63 = vsel %vm730_vm10, %v1405_v45, %v729_v46  ;;  %v684_v45 = vadd.f32 %v674_v2, %v664_v40 }
 0x135   : > { %v780_v61 = vadd.f32 %v779_v29, %v771_v35  ;;  %v1067_v0 = vpop.eup %1066  ;;  %v734_v6 = vsel %vm732_vm11, %v733_v21, %v731_v63  ;;  %v513_v58 = vmul.f32 %v1065_v60, %v1410_v52  ;;  %v1494_v20 = vadd.f32 %v432_v53, %v422_v17 }
 0x136   : > { %v854_v5 = vand.u32 2147483647, %v837_v54  ;;  %v821_v8 = vmul.f32 %v1067_v0, %v796_v14  ;;  %v762_v9 = vsub.f32 %v511_v62, %v734_v6  ;;  %v808_v56 = vadd.f32 1e-08, %v734_v6 }
 0x137   : > { %v1069_v7 = vpop.eup %1068  ;;  %v515_v12 = vsel %vm514_vm12, %v1410_v52, %v513_v58  ;;  %v665_v52 = vmul.f32 %v1366_v3, %v1366_v3  ;;  %v451_v31 = vadd.f32 %v450_v55, %v1494_v20  ;;  %v798_v33 = vadd.f32 1e-08, %v511_v62 }
 0x138   : > { %v863_v48 = vadd.f32 %v862_v47, %v854_v5  ;;  %v839_v10 = vmul.f32 0.6931472, %v1069_v7  ;;  %1076 = vlog2.f32 %v821_v8  ;;  %v772_v24 = vmul.f32 %v762_v9, %v762_v9  ;;  %v1071_v13 = vpop.eup %1070 }
 0x139   : > { %1078 = vrcp.f32 %v808_v56  ;;  %v736_v1 = vmul.f32 %v1071_v13, %v1440_v30  ;;  %v518_v57 = vsel %vm516_vm13, %v517_v11, %v515_v12  ;;  %vm521_vm0 = vcmp.eq.f32.partialorder %v1457_v50, inf }
 0x13a   : > { %v855_v15 = vand.u32 2147483647, %v839_v10  ;;  %v781_v14 = vadd.f32 %v780_v61, %v772_v24  ;;  %1080 = vrsqrt.f32 %v684_v45  ;;  %v452_v38 = vrot.slane %v451_v31, 4 }
 0x13b   : > { %v738_v22 = vsel %vm737_vm14, %v1440_v30, %v736_v1  ;;  %v1498_v30 = vadd.f32 %v675_v25, %v665_v52  ;;  %v524_v37 = vand.u32 2147483648, %v1457_v50  ;;  %vm523_vm1 = vcmp.eq.f32.partialorder %v1457_v50, 0.0 }
 0x13c   : > { %v864_v19 = vadd.f32 %v863_v48, %v855_v15  ;;  %v741_v59 = vsel %vm739_vm15, %v740_v23, %v738_v22  ;;  %v453_v47 = vadd.f32 %v452_v38, %v451_v31  ;;  %vm744_vm2 = vcmp.eq.f32.partialorder %v684_v45, inf }
 0x13d   : > { %v1073_v18 = vpop.eup %1072  ;;  %v763_v28 = vsub.f32 %v518_v57, %v741_v59  ;;  %v809_v29 = vadd.f32 1e-08, %v741_v59  ;;  %v747_v35 = vand.u32 2147483648, %v684_v45  ;;  %vm746_vm3 = vcmp.eq.f32.partialorder %v684_v45, 0.0 }
 0x13e   : > { %v1075_v27 = vpop.eup %1074  ;;  %v823_v26 = vmul.f32 %v1073_v18, %v797_v16  ;;  %v454_v46 = vrot.slane %v453_v47, 2  ;;  %v458_v41 = vlaneseq  ;;  %v799_v62 = vadd.f32 1e-08, %v518_v57 }
 0x13f   : > { %v520_v3 = vmul.f32 %v1075_v27, %v1457_v50  ;;  %v773_v32 = vmul.f32 %v763_v28, %v763_v28  ;;  %vm528_vm5 = vcmp.eq.f32.partialorder %v1494_v20, inf  ;;  %v531_v24 = vand.u32 2147483648, %v1494_v20 }
 0x140   : > { %1082 = vlog2.f32 %v823_v26  ;;  %v455_v60 = vadd.f32 %v454_v46, %v453_v47  ;;  %vm1518_vm4 = vcmp.lt.s32.totalorder %v458_v41, 128  ;;  %vm530_vm6 = vcmp.eq.f32.partialorder %v1494_v20, 0.0 }
 0x141   : > { %1084 = vrcp.f32 %v809_v29  ;;  %v782_v36 = vadd.f32 %v781_v14, %v773_v32  ;;  %v522_v43 = vsel %vm521_vm0, %v1457_v50, %v520_v3  ;;  %vm751_vm7 = vcmp.eq.f32.partialorder %v1498_v30, inf }
 0x142   : > { %1086 = vrsqrt.f32 %v1494_v20  ;;  %v1077_v4 = vpop.eup %1076  ;;  %v525_v51 = vsel %vm523_vm1, %v524_v37, %v522_v43  ;;  %v456_v50 = vrot.slane %v455_v60, 1  ;;  %v754_v16 = vand.u32 2147483648, %v1498_v30 }
 0x143   : > { %v1079_v39 = vpop.eup %1078  ;;  %v841_v42 = vmul.f32 0.6931472, %v1077_v4  ;;  %1088 = vrsqrt.f32 %v1498_v30  ;;  %vm753_vm8 = vcmp.eq.f32.partialorder %v1498_v30, 0.0  ;;  %v800_v18 = vadd.f32 1e-08, %v525_v51 }
 0x144   : > { %v1081_v44 = vpop.eup %1080  ;;  %v825_v34 = vmul.f32 %v1079_v39, %v798_v33  ;;  %v457_v56 = vadd.f32 %v456_v50, %v455_v60 }
 0x145   : > { %v856_v49 = vand.u32 2147483647, %v841_v42  ;;  %v743_v21 = vmul.f32 %v1081_v44, %v684_v45 }
 0x146   : > { %1090 = vlog2.f32 %v825_v34  ;;  %462 = vst.msk [vmem:[%s1516_s5 + $0x1] sm:$0x1] %vm1518_vm4, %v457_v56 }
 0x147   : > { %v865_v40 = vadd.f32 %v864_v19, %v856_v49  ;;  %v745_v54 = vsel %vm744_vm2, %v684_v45, %v743_v21 }
 0x148   : > { %v748_v55 = vsel %vm746_vm3, %v747_v35, %v745_v54 }
 0x149   : > { %v764_v63 = vsub.f32 %v525_v51, %v748_v55  ;;  %v810_v2 = vadd.f32 1e-08, %v748_v55 }
 0x14a   : > { %v1083_v61 = vpop.eup %1082 }
 0x14b   : > { %v1085_v0 = vpop.eup %1084  ;;  %v843_v5 = vmul.f32 0.6931472, %v1083_v61  ;;  %v774_v7 = vmul.f32 %v764_v63, %v764_v63  ;;  %1092 = vrcp.f32 %v810_v2 }
 0x14c   : > { %v1087_v6 = vpop.eup %1086  ;;  %v827_v58 = vmul.f32 %v1085_v0, %v799_v62 }
 0x14d   : > { %v857_v9 = vand.u32 2147483647, %v843_v5  ;;  %v527_v48 = vmul.f32 %v1087_v6, %v1494_v20  ;;  %v1089_v10 = vpop.eup %1088  ;;  %v783_v11 = vadd.f32 %v782_v36, %v774_v7 }
 0x14e   : > { %1094 = vlog2.f32 %v827_v58  ;;  %v750_v13 = vmul.f32 %v1089_v10, %v1498_v30 }
 0x14f   : > { %v866_v12 = vadd.f32 %v865_v40, %v857_v9  ;;  %v529_v45 = vsel %vm528_vm5, %v1494_v20, %v527_v48 }
 0x150   : > { %v532_v15 = vsel %vm530_vm6, %v531_v24, %v529_v45  ;;  %v1091_v14 = vpop.eup %1090  ;;  %v752_v1 = vsel %vm751_vm7, %v1498_v30, %v750_v13 }
 0x151   : > { %v845_v17 = vmul.f32 0.6931472, %v1091_v14  ;;  %v755_v19 = vsel %vm753_vm8, %v754_v16, %v752_v1  ;;  %v801_v31 = vadd.f32 1e-08, %v532_v15 }
 0x152   : > { %v765_v57 = vsub.f32 %v532_v15, %v755_v19  ;;  %v811_v23 = vadd.f32 1e-08, %v755_v19 }
 0x153   : > { %v858_v52 = vand.u32 2147483647, %v845_v17 }
 0x154   : > { %v775_v22 = vmul.f32 %v765_v57, %v765_v57  ;;  %1096 = vrcp.f32 %v811_v23 }
 0x155   : > { %v1093_v53 = vpop.eup %1092  ;;  %v867_v25 = vadd.f32 %v866_v12, %v858_v52 }
 0x156   : > { %v829_v27 = vmul.f32 %v1093_v53, %v800_v18  ;;  %v784_v26 = vadd.f32 %v783_v11, %v775_v22 }
 0x158   : > { %v1095_v59 = vpop.eup %1094  ;;  %1098 = vlog2.f32 %v829_v27  ;;  %v785_v29 = vrot.slane %v784_v26, 4 }
 0x159   : > { %v847_v28 = vmul.f32 0.6931472, %v1095_v59 }
 0x15a   : > { %v786_v3 = vadd.f32 %v785_v29, %v784_v26 }
 0x15b   : > { %v859_v20 = vand.u32 2147483647, %v847_v28 }
 0x15c   : > { %v787_v32 = vrot.slane %v786_v3, 2 }
 0x15d   : > { %v868_v30 = vadd.f32 %v867_v25, %v859_v20 }
 0x15e   : > { %v1097_v4 = vpop.eup %1096  ;;  %v788_v33 = vadd.f32 %v787_v32, %v786_v3 }
 0x15f   : > { %v831_v36 = vmul.f32 %v1097_v4, %v801_v31 }
 0x160   : > { %v789_v38 = vrot.slane %v788_v33, 1 }
 0x161   : > { %1100 = vlog2.f32 %v831_v36 }
 0x162   : > { %v1099_v39 = vpop.eup %1098  ;;  %v790_v42 = vadd.f32 %v789_v38, %v788_v33 }
 0x163   : > { %v849_v43 = vmul.f32 0.6931472, %v1099_v39 }
 0x164   : > { %791 = vst.msk [vmem:[%s1516_s5] sm:$0x1] %vm1518_vm4, %v790_v42 }
 0x165   : > { %v860_v44 = vand.u32 2147483647, %v849_v43 }
 0x167   : > { %v869_v34 = vadd.f32 %v868_v30, %v860_v44 }
 0x16b   : > { %v1101_v37 = vpop.eup %1100 }
 0x16c   : > { %v851_v47 = vmul.f32 0.6931472, %v1101_v37 }
 0x16e   : > { %v861_v49 = vand.u32 2147483647, %v851_v47 }
 0x170   : > { %v870_v21 = vadd.f32 %v869_v34, %v861_v49 }
 0x172   : > { %v871_v51 = vrot.slane %v870_v21, 4 }
 0x174   : > { %v872_v35 = vadd.f32 %v871_v51, %v870_v21 }
 0x176   : > { %v873_v46 = vrot.slane %v872_v35, 2 }
 0x178   : > { %v874_v40 = vadd.f32 %v873_v46, %v872_v35 }
 0x17a   : > { %v875_v54 = vrot.slane %v874_v40, 1 }
 0x17c   : > { %v876_v41 = vadd.f32 %v875_v54, %v874_v40 }
 0x17e   : > { %877 = vst.msk [vmem:[%s1516_s5 + $0x2] sm:$0x1] %vm1518_vm4, %v876_v41 }
 0x17f PF: > { %s13_s12 = sadd.s32 1, %s1108_s12  }
 0x180   : > { %p10_p5 = scmp.ge.s32.totalorder %s13_s12, 4  }
 0x182   :  { %12 = sbr.rel (!%p10_p5) target bundleno = 1 (0x1), region = 65 }

</bundles_post_ra>
